<compile_context>
chip_gen: v5e
topology: v5e:2x2
jax: 0.10.0
libtpu: 0.0.40
codegen_flags: <defaults>
</compile_context>

<pallas_src>
import functools

import jax
import jax.numpy as jnp
from jax.experimental import pallas as pl
from jax.experimental.pallas import tpu as pltpu


def _round_up(x, m):
    return ((x + m - 1) // m) * m


def _decoder_kernel(z_ref, w1_ref, b1_ref, w23_ref, b23_ref, out_ref):
    # fc1 + tanh: MXU matmul with f32 accumulation; bias add + tanh in f32.
    z = z_ref[...].astype(w1_ref.dtype)
    h = jnp.tanh(
        jnp.dot(z, w1_ref[...], preferred_element_type=jnp.float32)
        + b1_ref[...]
    )
    # Fused fc2||fc3: one MXU pass, one lane-dense (multiple-of-128) store.
    out = (
        jnp.dot(h.astype(w23_ref.dtype), w23_ref[...],
                preferred_element_type=jnp.float32)
        + b23_ref[...]
    )
    out_ref[...] = out.astype(out_ref.dtype)


def prepack_gaussian_decoder_params(w1, b1, w2, b2, w3, b3,
                                    compute_dtype=jnp.float32):
    """One-time packing/padding of the decoder weights for the Pallas kernel.

    w1: [z_dim, 2*z_dim], w2/w3: [2*z_dim, x_dim]; biases [out] or [1, out].
    Returns (packed_dict, x_dim).  Call once, reuse across forward calls.
    """
    z_dim, h_dim = w1.shape
    x_dim = w2.shape[1]
    h_dim_p = _round_up(h_dim, 128)
    out_w_p = _round_up(2 * x_dim, 128)   # packed mu||sigma width (lane-dense)

    b1 = jnp.asarray(b1, jnp.float32).reshape(1, -1)
    b2 = jnp.asarray(b2, jnp.float32).reshape(1, -1)
    b3 = jnp.asarray(b3, jnp.float32).reshape(1, -1)

    w1p = jnp.zeros((z_dim, h_dim_p), compute_dtype)
    w1p = w1p.at[:, :h_dim].set(w1.astype(compute_dtype))
    b1p = jnp.zeros((1, h_dim_p), jnp.float32).at[:, :h_dim].set(b1)

    w23p = jnp.zeros((h_dim_p, out_w_p), compute_dtype)
    w23p = w23p.at[:h_dim, :x_dim].set(w2.astype(compute_dtype))
    w23p = w23p.at[:h_dim, x_dim:2 * x_dim].set(w3.astype(compute_dtype))
    b23p = jnp.zeros((1, out_w_p), jnp.float32)
    b23p = b23p.at[:, :x_dim].set(b2)
    b23p = b23p.at[:, x_dim:2 * x_dim].set(b3)

    packed = dict(w1p=w1p, b1p=b1p, w23p=w23p, b23p=b23p)
    return packed, x_dim


@functools.partial(jax.jit, static_argnames=("x_dim", "block_b"))
def gaussian_decoder_forward_packed(z, w1p, b1p, w23p, b23p, *,
                                    x_dim, block_b=512):
    """Forward with pre-packed weights.  z: [B, z_dim] -> (mu, sigma)."""
    B, z_dim = z.shape
    h_dim_p = w1p.shape[1]
    out_w_p = w23p.shape[1]
    compute_dtype = w1p.dtype
    out_dtype = z.dtype

    # Batch tiling: a single fat block for small B (block dim == full array
    # dim is always legal -> one grid step, no forced megacore split), and
    # 512-row (default) sublane-aligned tiles for large B, with the partial
    # edge block masked by Pallas (no host-side padding of z).
    if B <= block_b:
        blk = B
    else:
        mult = 16 if compute_dtype == jnp.bfloat16 else 8
        blk = max(mult, (block_b // mult) * mult)
    grid = (pl.cdiv(B, blk),)

    in_specs = [
        pl.BlockSpec((blk, z_dim), lambda i: (i, 0)),         # z tile
        pl.BlockSpec((z_dim, h_dim_p), lambda i: (0, 0)),     # w1 (resident)
        pl.BlockSpec((1, h_dim_p), lambda i: (0, 0)),         # b1
        pl.BlockSpec((h_dim_p, out_w_p), lambda i: (0, 0)),   # w2||w3
        pl.BlockSpec((1, out_w_p), lambda i: (0, 0)),         # b2||b3
    ]
    out_specs = pl.BlockSpec((blk, out_w_p), lambda i: (i, 0))

    # ---- VMEM budget (double-buffered tiles) + cost hint ------------------
    csz = jnp.dtype(compute_dtype).itemsize
    zsz = jnp.dtype(z.dtype).itemsize
    osz = jnp.dtype(out_dtype).itemsize
    vmem_est = 2 * (
        blk * z_dim * zsz
        + z_dim * h_dim_p * csz
        + h_dim_p * 4
        + h_dim_p * out_w_p * csz
        + out_w_p * 4
        + blk * out_w_p * osz
    )
    # Stay well under v7x's 64 MiB physical VMEM per TensorCore.
    vmem_limit = int(min(max(vmem_est + (4 << 20), 16 << 20), 48 << 20))

    flops = 2 * B * (z_dim * h_dim_p + h_dim_p * out_w_p)
    bytes_accessed = (
        B * z_dim * zsz
        + z_dim * h_dim_p * csz + h_dim_p * 4
        + h_dim_p * out_w_p * csz + out_w_p * 4
        + B * out_w_p * osz
    )
    cost = pl.CostEstimate(flops=flops,
                           transcendentals=B * h_dim_p,
                           bytes_accessed=bytes_accessed)

    out = pl.pallas_call(
        _decoder_kernel,
        out_shape=jax.ShapeDtypeStruct((B, out_w_p), out_dtype),
        grid_spec=pltpu.PrefetchScalarGridSpec(
            num_scalar_prefetch=0,
            grid=grid,
            in_specs=in_specs,
            out_specs=out_specs,
        ),
        compiler_params=pltpu.CompilerParams(
            dimension_semantics=("parallel",),
            vmem_limit_bytes=vmem_limit,
        ),
        cost_estimate=cost,
    )(z, w1p, b1p, w23p, b23p)

    mu = out[:, :x_dim]
    sigma = out[:, x_dim:2 * x_dim]
    return mu, sigma


def gaussian_decoder_forward(z, w1, b1, w2, b2, w3, b3, *,
                             block_b=512, compute_dtype=jnp.float32):
    """Convenience one-shot path (packs weights per call).  For repeated
    inference, call prepack_gaussian_decoder_params once and use
    gaussian_decoder_forward_packed."""
    packed, x_dim = prepack_gaussian_decoder_params(
        w1, b1, w2, b2, w3, b3, compute_dtype=compute_dtype)
    return gaussian_decoder_forward_packed(
        z, packed["w1p"], packed["b1p"], packed["w23p"], packed["b23p"],
        x_dim=x_dim, block_b=block_b)


def init_linear_params(key, in_features, out_features, dtype=jnp.float32):
    """Deterministic init matching torch.nn.Linear default:
    U(-1/sqrt(fan_in), 1/sqrt(fan_in)) for weight and bias.
    Weight stored as [in, out] (transposed w.r.t. PyTorch's [out, in])."""
    kw, kb = jax.random.split(key)
    bound = 1.0 / jnp.sqrt(jnp.asarray(in_features, dtype))
    w = jax.random.uniform(kw, (in_features, out_features), dtype,
                           minval=-bound, maxval=bound)
    b = jax.random.uniform(kb, (1, out_features), dtype,
                           minval=-bound, maxval=bound)
    return w, b


def reference_forward(z, w1, b1, w2, b2, w3, b3):
    h = jnp.tanh(z @ w1 + b1)
    return h @ w2 + b2, h @ w3 + b3


if __name__ == "__main__":
    # Small shapes consistent with the module: z_dim latent, x_dim output.
    B, z_dim, x_dim = 16, 32, 64
    h_dim = 2 * z_dim

    key = jax.random.PRNGKey(0)
    kz, k1, k2, k3, kz2 = jax.random.split(key, 5)

    z = jax.random.normal(kz, (B, z_dim), jnp.float32)
    w1, b1 = init_linear_params(k1, z_dim, h_dim)
    w2, b2 = init_linear_params(k2, h_dim, x_dim)
    w3, b3 = init_linear_params(k3, h_dim, x_dim)

    mu_ref, sigma_ref = reference_forward(z, w1, b1, w2, b2, w3, b3)

    # Prepack once (f32 default), reuse across calls — tight tolerance.
    packed, xd = prepack_gaussian_decoder_params(w1, b1, w2, b2, w3, b3)
    mu, sigma = gaussian_decoder_forward_packed(
        z, packed["w1p"], packed["b1p"], packed["w23p"], packed["b23p"],
        x_dim=xd)
    jax.block_until_ready((mu, sigma))
    assert mu.shape == (B, x_dim) and sigma.shape == (B, x_dim)
    assert jnp.allclose(mu, mu_ref, atol=1e-5, rtol=1e-5)
    assert jnp.allclose(sigma, sigma_ref, atol=1e-5, rtol=1e-5)

    # Ragged batch: exercises the masked partial edge block (no host padding).
    B2 = 50
    z2 = jax.random.normal(kz2, (B2, z_dim), jnp.float32)
    mu2_ref, sigma2_ref = reference_forward(z2, w1, b1, w2, b2, w3, b3)
    mu2, sigma2 = gaussian_decoder_forward_packed(
        z2, packed["w1p"], packed["b1p"], packed["w23p"], packed["b23p"],
        x_dim=xd, block_b=32)
    jax.block_until_ready((mu2, sigma2))
    assert mu2.shape == (B2, x_dim) and sigma2.shape == (B2, x_dim)
    assert jnp.allclose(mu2, mu2_ref, atol=1e-5, rtol=1e-5)
    assert jnp.allclose(sigma2, sigma2_ref, atol=1e-5, rtol=1e-5)

    # Opt-in bf16 MXU path (f32 accumulation) — documented looser tolerance.
    mu_bf, sigma_bf = gaussian_decoder_forward(
        z, w1, b1, w2, b2, w3, b3, compute_dtype=jnp.bfloat16)
    jax.block_until_ready((mu_bf, sigma_bf))
    assert jnp.allclose(mu_bf, mu_ref, atol=3e-2, rtol=3e-2)
    assert jnp.allclose(sigma_bf, sigma_ref, atol=3e-2, rtol=3e-2)

    print("KERNEL_OK")
</pallas_src>

<mosaic_0001>
module attributes {stable_mosaic.version = 11 : i64} {
  func.func @_decoder_kernel(%arg0: i32, %arg1: memref<16x32xf32, #tpu.memory_space<vmem>>, %arg2: memref<32x128xf32, #tpu.memory_space<vmem>>, %arg3: memref<1x128xf32, #tpu.memory_space<vmem>>, %arg4: memref<128x128xf32, #tpu.memory_space<vmem>>, %arg5: memref<1x128xf32, #tpu.memory_space<vmem>>, %arg6: memref<16x128xf32, #tpu.memory_space<vmem>>) attributes {dimension_semantics = [#tpu.dimension_semantics<parallel>], iteration_bounds = array<i64: 1>, scalar_prefetch = 0 : i64, scratch_operands = 0 : i64, tpu.core_type = #tpu.core_type<tc>, window_params = [{transform_indices = @transform_0, window_bounds = array<i64: 16, 32>}, {pipeline_mode = #tpu.pipeline_mode<synchronous>, transform_indices = @transform_1, window_bounds = array<i64: 32, 128>}, {pipeline_mode = #tpu.pipeline_mode<synchronous>, transform_indices = @transform_2, window_bounds = array<i64: 1, 128>}, {pipeline_mode = #tpu.pipeline_mode<synchronous>, transform_indices = @transform_3, window_bounds = array<i64: 128, 128>}, {pipeline_mode = #tpu.pipeline_mode<synchronous>, transform_indices = @transform_4, window_bounds = array<i64: 1, 128>}, {transform_indices = @transform_5, window_bounds = array<i64: 16, 128>}]} {
    %c0 = arith.constant 0 : index
    %c0_0 = arith.constant 0 : index
    %0 = vector.load %arg1[%c0, %c0_0] : memref<16x32xf32, #tpu.memory_space<vmem>>, vector<16x32xf32>
    %c0_1 = arith.constant 0 : index
    %c0_2 = arith.constant 0 : index
    %1 = vector.load %arg2[%c0_1, %c0_2] : memref<32x128xf32, #tpu.memory_space<vmem>>, vector<32x128xf32>
    %cst = arith.constant dense<0.000000e+00> : vector<16x128xf32>
    %2 = tpu.matmul %0, %1, %cst {dimension_numbers = #tpu.dot_dimension_numbers<[1], [0], [0], [1], [0, 0, 1, 1], [], []>} : vector<16x32xf32>, vector<32x128xf32>, vector<16x128xf32> -> vector<16x128xf32>
    %c0_3 = arith.constant 0 : index
    %c0_4 = arith.constant 0 : index
    %3 = vector.load %arg3[%c0_3, %c0_4] : memref<1x128xf32, #tpu.memory_space<vmem>>, vector<1x128xf32>
    %4 = vector.broadcast %3 : vector<1x128xf32> to vector<16x128xf32>
    %5 = arith.addf %2, %4 : vector<16x128xf32>
    %6 = math.tanh %5 : vector<16x128xf32>
    %c0_5 = arith.constant 0 : index
    %c0_6 = arith.constant 0 : index
    %7 = vector.load %arg4[%c0_5, %c0_6] : memref<128x128xf32, #tpu.memory_space<vmem>>, vector<128x128xf32>
    %cst_7 = arith.constant dense<0.000000e+00> : vector<16x128xf32>
    %8 = tpu.matmul %6, %7, %cst_7 {dimension_numbers = #tpu.dot_dimension_numbers<[1], [0], [0], [1], [0, 0, 1, 1], [], []>} : vector<16x128xf32>, vector<128x128xf32>, vector<16x128xf32> -> vector<16x128xf32>
    %c0_8 = arith.constant 0 : index
    %c0_9 = arith.constant 0 : index
    %9 = vector.load %arg5[%c0_8, %c0_9] : memref<1x128xf32, #tpu.memory_space<vmem>>, vector<1x128xf32>
    %10 = vector.broadcast %9 : vector<1x128xf32> to vector<16x128xf32>
    %11 = arith.addf %8, %10 : vector<16x128xf32>
    %c0_10 = arith.constant 0 : index
    %c0_11 = arith.constant 0 : index
    %12 = vector.load %arg6[%c0_10, %c0_11] : memref<16x128xf32, #tpu.memory_space<vmem>>, vector<16x128xf32>
    tpu.vector_store %arg6[%c0_10, %c0_11], %11 {strides = array<i32>} : memref<16x128xf32, #tpu.memory_space<vmem>>, vector<16x128xf32>,
    return
  }
  func.func @transform_0(%arg0: i32) -> (i32, i32) {
    %c0_i32 = arith.constant 0 : i32
    %c0_i32_0 = arith.constant 0 : i32
    return %arg0, %c0_i32 : i32, i32
  }
  func.func @transform_1(%arg0: i32) -> (i32, i32) {
    %c0_i32 = arith.constant 0 : i32
    %c0_i32_0 = arith.constant 0 : i32
    %c0_i32_1 = arith.constant 0 : i32
    return %c0_i32, %c0_i32_0 : i32, i32
  }
  func.func @transform_2(%arg0: i32) -> (i32, i32) {
    %c0_i32 = arith.constant 0 : i32
    %c0_i32_0 = arith.constant 0 : i32
    %c0_i32_1 = arith.constant 0 : i32
    return %c0_i32, %c0_i32_0 : i32, i32
  }
  func.func @transform_3(%arg0: i32) -> (i32, i32) {
    %c0_i32 = arith.constant 0 : i32
    %c0_i32_0 = arith.constant 0 : i32
    %c0_i32_1 = arith.constant 0 : i32
    return %c0_i32, %c0_i32_0 : i32, i32
  }
  func.func @transform_4(%arg0: i32) -> (i32, i32) {
    %c0_i32 = arith.constant 0 : i32
    %c0_i32_0 = arith.constant 0 : i32
    %c0_i32_1 = arith.constant 0 : i32
    return %c0_i32, %c0_i32_0 : i32, i32
  }
  func.func @transform_5(%arg0: i32) -> (i32, i32) {
    %c0_i32 = arith.constant 0 : i32
    %c0_i32_0 = arith.constant 0 : i32
    return %arg0, %c0_i32 : i32, i32
  }
}

</mosaic_0001>

<bundles_post_ra>
// kernel: gaussian_decoder_forward_packed.1
= control target key start
LH: loop header
LB: loop body
LE: loop exit
PB: predicated region body
PF: predicated region fallthrough
CT: control target
= control target key end

     0   :  { %10 = vsyncpa [#allocation3], 0  ;;  %s323_s0 = inlined_call_operand.hbm [shape: f32[16,32], index: 0, kind: input, shape index: {}]   ;;  %s324_s1 = inlined_call_operand.hbm [shape: f32[32,128], index: 1, kind: input, shape index: {}]   ;;  %s325_s2 = inlined_call_operand.vmem [shape: f32[1,128], index: 2, kind: input, shape index: {}]   ;;  %s326_s3 = inlined_call_operand.hbm [shape: f32[128,128], index: 3, kind: input, shape index: {}]   ;;  %s327_s4 = inlined_call_operand.vmem [shape: f32[1,128], index: 4, kind: input, shape index: {}]   ;;  %s328_s5 = inlined_call_operand.vmem [shape: f32[16,128], index: 5, kind: output, shape index: {}]  }
   0x1   :  { %11 = vsyncpa [#allocation5], 0  ;;  %s29_s20 = sshll.u32 %s324_s1, 4  ;;  %s265_s21 = smov [#allocation4]   ;;  %s30_s20 = int_to_ptr.hbm [resolvable:$true] %s29_s20 }
   0x2   :  { %s31_s22 = sshll.u32 %s265_s21, 4  ;;  %s16_s25 = sshll.u32 %s323_s0, 4  ;;  %s32_s22 = int_to_ptr.vmem [resolvable:$true] %s31_s22  ;;  %s17_s25 = int_to_ptr.hbm [resolvable:$true] %s16_s25 }
   0x3   :  { %s266_s26 = smov 128   ;;  %s267_s27 = smov 8  }
   0x4   :  { %37 = dma.hbm_to_vmem [thread:$0]  %s30_s20, 512, %s32_s22, [#allocation5], %s266_s26, %s266_s26, %s267_s27  }
   0x5   :  { %s268_s28 = smov [#allocation2]   ;;  %s44_s7 = sshll.u32 %s326_s3, 4  ;;  %s45_s7 = int_to_ptr.hbm [resolvable:$true] %s44_s7 }
   0x6   :  { %s18_s29 = sshll.u32 %s268_s28, 4  ;;  %s269_s1 = smov [#allocation6]   ;;  %s19_s29 = int_to_ptr.vmem [resolvable:$true] %s18_s29 }
   0x7   :  { %24 = dma.hbm_to_vmem [thread:$0]  %s17_s25, 256, %s19_s29, [#allocation3], %s266_s26, %s266_s26, %s267_s27  }
   0x8   :  { %s46_s8 = sshll.u32 %s269_s1, 4  ;;  %s47_s8 = int_to_ptr.vmem [resolvable:$true] %s46_s8 }
   0x9   :  { %52 = dma.hbm_to_vmem [thread:$0]  %s45_s7, 2048, %s47_s8, [#allocation5], %s266_s26, %s266_s26, %s267_s27  }
   0xa   :  { %261 = dma.done.wait [#allocation3], 256  }
   0xb   :  { %262 = vsyncadd [#allocation3], 4294967040 }
   0xc   :  { %263 = dma.done.wait [#allocation5], 2560  }
   0xd   :  { %264 = vsyncadd [#allocation5], 4294964736  ;;  %v72_v0 = vld [vmem:[#allocation4 + $0x18] sm:$0xff]  ;;  %v71_v1 = vld [vmem:[#allocation4 + $0x10] sm:$0xff]  ;;  %vm77_vm0 = vcmask 261120  }
   0xe   :  { %96 = vmatpush.msra.mxu0 %v72_v0  ;;  %v70_v2 = vld [vmem:[#allocation4 + $0x8] sm:$0xff]  ;;  %v124_v3 = vld [vmem:[#allocation6 + $0x78] sm:$0xff]  ;;  %v123_v4 = vld [vmem:[#allocation6 + $0x70] sm:$0xff] }
   0xf   :  { %129 = vmatpush.msra.mxu1 %v124_v3  ;;  %v69_v5 = vld [vmem:[#allocation4] sm:$0xff]  ;;  %v122_v6 = vld [vmem:[#allocation6 + $0x68] sm:$0xff]  ;;  %162 = vmatpush.msra.mxu2 %v124_v3  ;;  %v67_v7 = vld [vmem:[#allocation2] sm:$0xff] }
  0x10   :  { %97 = vmatpush.msra.mxu0 %v71_v1  ;;  %v121_v8 = vld [vmem:[#allocation6 + $0x60] sm:$0xff]  ;;  %v120_v9 = vld [vmem:[#allocation6 + $0x58] sm:$0xff]  ;;  %v119_v10 = vld [vmem:[#allocation6 + $0x50] sm:$0xff] }
  0x11   :  { %130 = vmatpush.msra.mxu1 %v123_v4  ;;  %163 = vmatpush.msra.mxu2 %v123_v4  ;;  %v118_v11 = vld [vmem:[#allocation6 + $0x48] sm:$0xff]  ;;  %v68_v12 = vld [vmem:[#allocation2 + $0x8] sm:$0xff]  ;;  %v117_v13 = vld [vmem:[#allocation6 + $0x40] sm:$0xff] }
  0x12   :  { %98 = vmatpush.msra.mxu0 %v70_v2  ;;  %v116_v14 = vld [vmem:[#allocation6 + $0x38] sm:$0xff]  ;;  %v115_v15 = vld [vmem:[#allocation6 + $0x30] sm:$0xff]  ;;  %v114_v16 = vld [vmem:[#allocation6 + $0x28] sm:$0xff] }
  0x13   :  { %131 = vmatpush.msra.mxu1 %v122_v6  ;;  %164 = vmatpush.msra.mxu2 %v122_v6  ;;  %v113_v17 = vld [vmem:[#allocation6 + $0x20] sm:$0xff]  ;;  %v112_v18 = vld [vmem:[#allocation6 + $0x18] sm:$0xff]  ;;  %v111_v19 = vld [vmem:[#allocation6 + $0x10] sm:$0xff] }
  0x14   :  { %99 = vmatpush.msra.mxu0 %v69_v5  ;;  %v110_v20 = vld [vmem:[#allocation6 + $0x8] sm:$0xff]  ;;  %v109_v21 = vld [vmem:[#allocation6] sm:$0xff]  ;;  %v183_v22 = vld [vmem:[%s325_s2] ss:$0 sm:$0xff] }
  0x15   :  { %160 = vmatmul.msk.f32.vlgmr.msra.gmra.mxu0 %vm77_vm0, %v67_v7  ;;  %132 = vmatpush.msra.mxu1 %v121_v8  ;;  %v184_v29 = vld [vmem:[%s327_s4] ss:$0 sm:$0xff] }
  0x16   :  { %165 = vmatpush.msra.mxu2 %v121_v8 }
  0x17   :  { %133 = vmatpush.msra.mxu1 %v120_v9 }
  0x18   :  { %166 = vmatpush.msra.mxu2 %v120_v9 }
  0x19   :  { %134 = vmatpush.msra.mxu1 %v119_v10 }
  0x1a   :  { %167 = vmatpush.msra.mxu2 %v119_v10 }
  0x1b   :  { %135 = vmatpush.msra.mxu1 %v118_v11 }
  0x1c   :  { %168 = vmatpush.msra.mxu2 %v118_v11 }
  0x1d   :  { %161 = vmatmul.msk.f32.gmra.mxu0 %vm77_vm0, %v68_v12  ;;  %136 = vmatpush.msra.mxu1 %v117_v13 }
  0x1e   :  { %169 = vmatpush.msra.mxu2 %v117_v13 }
  0x1f   :  { %137 = vmatpush.msra.mxu1 %v116_v14 }
  0x20   :  { %170 = vmatpush.msra.mxu2 %v116_v14 }
  0x21   :  { %138 = vmatpush.msra.mxu1 %v115_v15 }
  0x22   :  { %171 = vmatpush.msra.mxu2 %v115_v15 }
  0x23   :  { %139 = vmatpush.msra.mxu1 %v114_v16 }
  0x24   :  { %172 = vmatpush.msra.mxu2 %v114_v16 }
  0x25   :  { %140 = vmatpush.msra.mxu1 %v113_v17 }
  0x26   :  { %173 = vmatpush.msra.mxu2 %v113_v17 }
  0x27   :  { %141 = vmatpush.msra.mxu1 %v112_v18 }
  0x28   :  { %174 = vmatpush.msra.mxu2 %v112_v18 }
  0x29   :  { %142 = vmatpush.msra.mxu1 %v111_v19 }
  0x2a   :  { %175 = vmatpush.msra.mxu2 %v111_v19 }
  0x2b   :  { %143 = vmatpush.msra.mxu1 %v110_v20 }
  0x2c   :  { %176 = vmatpush.msra.mxu2 %v110_v20 }
  0x2d   :  { %144 = vmatpush.msra.mxu1 %v109_v21 }
  0x2e   :  { %177 = vmatpush.msra.mxu2 %v109_v21 }
  0x92   :  { %v101_v23 = vpop.f32.mrf.mxu0 }
  0x93   :  { %v102_v24 = vadd.f32 %v183_v22, %v101_v23 }
  0x95   :  { %185 = vtanh.f32 %v102_v24 }
  0x9a   :  { %v104_v25 = vpop.f32.mrf.mxu0 }
  0x9b   :  { %v186_v26 = vpop.eup %185  ;;  %v105_v27 = vadd.f32 %v183_v22, %v104_v25 }
  0x9c   :  { %145 = vmatmul.f32.vlgmr.msra.gmra.mxu1 %v186_v26 }
  0x9d   :  { %187 = vtanh.f32 %v105_v27 }
  0xa3   :  { %v188_v28 = vpop.eup %187 }
  0xa4   :  { %148 = vmatmul.f32.vlgmr.msra.gmra.mxu2 %v188_v28 }
 0x119   :  { %v146_v30 = vpop.f32.mrf.mxu1 }
 0x11a   :  { %v147_v31 = vadd.f32 %v184_v29, %v146_v30 }
 0x11c   :  { %152 = vst [vmem:[%s328_s5] sm:$0xff] %v147_v31 }
 0x127   :  { %v149_v32 = vpop.f32.mrf.mxu2 }
 0x128   :  { %v150_v33 = vadd.f32 %v184_v29, %v149_v32 }
 0x12a   :  { %153 = vst [vmem:[%s328_s5 + $0x8] sm:$0xff] %v150_v33 }
 0x12b   :  { %158 = vsyncpa [#allocation3], 1 }
 0x12c   :  { %159 = vsyncpa [#allocation5], 1 }

</bundles_post_ra>
